<compile_context>
chip_gen: v5e
topology: v5e:2x2
jax: 0.10.0
libtpu: 0.0.40
codegen_flags: <defaults>
</compile_context>

<pallas_src>
import functools

import jax
import jax.numpy as jnp
from jax.experimental import pallas as pl
from jax.experimental.pallas import tpu as pltpu


def _round_up(x, m):
    return ((x + m - 1) // m) * m


def gcn_kernel(adj_ref, feat_ref, w_ref, b_ref, o_ref, acc_ref, deg_ref, *,
               deg_col, apply_weight):
    """One (row-tile i, source-tile k) grid step.

    adj_ref : (TM, TK)       bf16 adjacency tile (dst rows x src cols)
    feat_ref: (TK, Fp)       bf16 source-node features; if deg_col is not
                             None, column `deg_col` is all ones so the matmul
                             also accumulates the in-degree.
    w_ref   : (Fp, Fo)       f32 transposed linear weight (or unused dummy)
    b_ref   : (1,  Fo)       f32 bias
    o_ref   : (TM, Fo)       f32 output tile
    acc_ref : (TM, Fp)       f32 accumulator scratch (persists across k)
    deg_ref : (TM, 1)        f32 in-degree scratch (used iff deg_col is None)
    """
    k = pl.program_id(1)

    @pl.when(k == 0)
    def _init():
        acc_ref[...] = jnp.zeros_like(acc_ref)
        if deg_col is None:
            deg_ref[...] = jnp.zeros_like(deg_ref)

    adj = adj_ref[...]
    # Native bf16 x bf16 MXU matmul, f32 accumulation.
    acc_ref[...] += jnp.dot(adj, feat_ref[...],
                            preferred_element_type=jnp.float32)
    if deg_col is None:
        # XLU lane-reduce; rides a free slot in this HBM-bound kernel.
        deg_ref[...] += jnp.sum(adj.astype(jnp.float32), axis=1,
                                keepdims=True)

    @pl.when(k == pl.num_programs(1) - 1)
    def _finalize():
        acc = acc_ref[...]
        if deg_col is None:
            deg = deg_ref[...]                                # [TM, 1]
        else:
            deg = acc[:, deg_col:deg_col + 1]                 # fused ones-col
        # DGL fn.mean convention: zero in-degree -> 0. Reciprocal on the EUP.
        inv = jnp.where(deg > 0.0,
                        pl.reciprocal(jnp.maximum(deg, 1.0), approx=True),
                        0.0)
        h = acc * inv                                         # mean aggregation
        if apply_weight:
            h = jnp.dot(h, w_ref[...], preferred_element_type=jnp.float32)
        o_ref[...] = jnp.maximum(h + b_ref[...], 0.0)         # Linear + ReLU


def gcn_forward(adj, x, w_t, b, *, tm=512, tk=2048):
    """adj: [N, N] dense dst<-src adjacency, x: [N, in_feats],
    w_t: [in_feats, out_feats] (transposed nn.Linear weight), b: [out_feats]."""
    n = adj.shape[0]
    in_feats = x.shape[1]
    out_feats = w_t.shape[1]

    # Matmul-order choice: run the O(N^2) aggregation over the narrower
    # feature width (1/deg diagonal scaling commutes with the weight).
    apply_weight = out_feats >= in_feats
    if apply_weight:
        feat = x                                              # aggregate X, then @W
    else:
        feat = jnp.dot(x.astype(jnp.float32), w_t.astype(jnp.float32))
    f_feat = feat.shape[1]

    # Degree handling: fuse an all-ones column only when it is free (feature
    # width not already a multiple of 128); otherwise row-sum in the kernel.
    fuse_degree = (f_feat % 128) != 0
    if fuse_degree:
        f_feat_pad = _round_up(f_feat + 1, 128)
        deg_col = f_feat
    else:
        f_feat_pad = f_feat
        deg_col = None
    f_out_pad = _round_up(out_feats, 128) if apply_weight else f_feat_pad

    # ---- tile selection -----------------------------------------------------
    tm = min(tm, _round_up(n, 16))          # bf16 sublane packing wants x16
    tk = min(tk, _round_up(n, 128))         # lanes
    # Keep >= 2 row tiles when N allows it (v7x megacore sharding).
    if n >= 512 and _round_up(n, tm) // tm < 2:
        tm = _round_up((n + 1) // 2, 256)

    w_bytes = (f_feat_pad * f_out_pad * 4) if apply_weight else (8 * 128 * 4)
    b_bytes = f_out_pad * 4

    def est_vmem(tm_, tk_):
        return (2 * tm_ * tk_ * 2              # adj tiles (bf16, 2 buffers)
                + 2 * tk_ * f_feat_pad * 2     # feat tiles (bf16, 2 buffers)
                + tm_ * f_feat_pad * 4         # f32 accumulator
                + tm_ * 128 * 4                # degree scratch (lane-padded)
                + 2 * tm_ * f_out_pad * 4      # output tiles
                + 2 * (w_bytes + b_bytes))

    vmem_budget = 40 * 1024 * 1024             # fits every generation w/ limit
    while est_vmem(tm, tk) > vmem_budget and tk > 512:
        tk = max(512, _round_up(tk // 2, 128))
    while est_vmem(tm, tk) > vmem_budget and tm > 256:
        tm = max(256, _round_up(tm // 2, 16))

    n_rows = _round_up(n, tm)
    n_cols = _round_up(n, tk)

    # ---- operand staging ----------------------------------------------------
    # Adjacency in bf16 (exact for 0/1). Skip the extra HBM pass when the
    # caller already hands us a tile-aligned bf16 adjacency.
    if adj.dtype == jnp.bfloat16 and adj.shape == (n_rows, n_cols):
        adj_p = adj
    else:
        adj_p = jnp.zeros((n_rows, n_cols), jnp.bfloat16)
        adj_p = adj_p.at[:n, :n].set(adj.astype(jnp.bfloat16))

    if (not fuse_degree and feat.dtype == jnp.bfloat16
            and feat.shape == (n_cols, f_feat_pad)):
        feat_p = feat
    else:
        feat_p = jnp.zeros((n_cols, f_feat_pad), jnp.bfloat16)
        feat_p = feat_p.at[:n, :f_feat].set(feat.astype(jnp.bfloat16))
        if fuse_degree:
            feat_p = feat_p.at[:, deg_col].set(jnp.bfloat16(1.0))

    b_p = jnp.zeros((1, f_out_pad), jnp.float32)
    b_p = b_p.at[0, :out_feats].set(b.astype(jnp.float32))

    if apply_weight:
        w_p = jnp.zeros((f_feat_pad, f_out_pad), jnp.float32)
        w_p = w_p.at[:in_feats, :out_feats].set(w_t.astype(jnp.float32))
    else:
        w_p = jnp.zeros((8, 128), jnp.float32)   # unused placeholder

    grid = (n_rows // tm, n_cols // tk)
    n_row_tiles = grid[0]

    kernel = functools.partial(gcn_kernel, deg_col=deg_col,
                               apply_weight=apply_weight)

    flops = 2 * n_rows * n_cols * f_feat_pad
    if apply_weight:
        flops += 2 * n_rows * f_feat_pad * f_out_pad
    bytes_accessed = (n_rows * n_cols * 2                       # adj, once
                      + n_row_tiles * n_cols * f_feat_pad * 2   # feat restream
                      + n_row_tiles * (w_bytes + b_bytes)
                      + n_rows * f_out_pad * 4)                 # output

    out = pl.pallas_call(
        kernel,
        out_shape=jax.ShapeDtypeStruct((n_rows, f_out_pad), jnp.float32),
        grid_spec=pltpu.PrefetchScalarGridSpec(
            num_scalar_prefetch=0,
            grid=grid,
            in_specs=[
                pl.BlockSpec((tm, tk), lambda i, k: (i, k)),           # adj
                pl.BlockSpec((tk, f_feat_pad), lambda i, k: (k, 0)),   # feat
                pl.BlockSpec(w_p.shape, lambda i, k: (0, 0)),          # weight
                pl.BlockSpec((1, f_out_pad), lambda i, k: (0, 0)),     # bias
            ],
            out_specs=pl.BlockSpec((tm, f_out_pad), lambda i, k: (i, 0)),
            scratch_shapes=[pltpu.VMEM((tm, f_feat_pad), jnp.float32),
                            pltpu.VMEM((tm, 1), jnp.float32)],
        ),
        compiler_params=pltpu.CompilerParams(
            dimension_semantics=("parallel", "arbitrary"),
            vmem_limit_bytes=48 * 1024 * 1024),
        cost_estimate=pl.CostEstimate(flops=flops,
                                      transcendentals=n_rows,
                                      bytes_accessed=bytes_accessed),
    )(adj_p, feat_p, w_p, b_p)

    return out[:n, :out_feats]


def _ref_gcn(adj, x, w, b):
    deg = jnp.sum(adj, axis=1, keepdims=True)
    inv = jnp.where(deg > 0, 1.0 / jnp.maximum(deg, 1.0), 0.0)
    return jnp.maximum(((adj @ x) * inv) @ w.T + b, 0.0)


if __name__ == "__main__":
    key = jax.random.PRNGKey(0)
    k_adj, k_x, k_w, k_b = jax.random.split(key, 4)

    N = 8  # number of graph nodes

    # deterministic random dense dst<-src adjacency
    adj = (jax.random.uniform(k_adj, (N, N)) < 0.4).astype(jnp.float32)

    def run_case(in_feats, out_feats):
        x = jax.random.normal(k_x, (N, in_feats), dtype=jnp.float32)
        # nn.Linear params, xavier_normal_ weight
        std = (2.0 / (in_feats + out_feats)) ** 0.5
        w = std * jax.random.normal(k_w, (out_feats, in_feats),
                                    dtype=jnp.float32)
        bound = 1.0 / (in_feats ** 0.5)
        b = jax.random.uniform(k_b, (out_feats,), minval=-bound, maxval=bound,
                               dtype=jnp.float32)
        out = jax.block_until_ready(gcn_forward(adj, x, w.T, b))
        ref = _ref_gcn(adj, x, w, b)
        assert out.shape == (N, out_feats)
        # bf16 feature storage -> relaxed tolerance vs. the f32 reference
        err = float(jnp.max(jnp.abs(out - ref)))
        assert jnp.allclose(out, ref, atol=3e-2, rtol=3e-2), err

    # path 1: out >= in  (aggregate bf16 X, apply W in-kernel), fused deg column
    run_case(16, 32)
    # path 2: out < in   (weight pre-applied, aggregation only), fused deg column
    run_case(16, 8)
    # path 3: feature width already a multiple of 128 -> in-kernel row-sum degree
    run_case(128, 128)

    print("KERNEL_OK")
</pallas_src>

<mosaic_0001>
module attributes {stable_mosaic.version = 11 : i64} {
  func.func @gcn_kernel(%arg0: i32, %arg1: i32, %arg2: memref<16x128xbf16, #tpu.memory_space<vmem>>, %arg3: memref<128x128xbf16, #tpu.memory_space<vmem>>, %arg4: memref<128x128xf32, #tpu.memory_space<vmem>>, %arg5: memref<1x128xf32, #tpu.memory_space<vmem>>, %arg6: memref<16x128xf32, #tpu.memory_space<vmem>>, %arg7: memref<16x128xf32, #tpu.memory_space<vmem>>, %arg8: memref<16x1xf32, #tpu.memory_space<vmem>>) attributes {dimension_semantics = [#tpu.dimension_semantics<parallel>, #tpu.dimension_semantics<arbitrary>], iteration_bounds = array<i64: 1, 1>, scalar_prefetch = 0 : i64, scratch_operands = 2 : i64, tpu.core_type = #tpu.core_type<tc>, window_params = [{transform_indices = @transform_0, window_bounds = array<i64: 16, 128>}, {transform_indices = @transform_1, window_bounds = array<i64: 128, 128>}, {pipeline_mode = #tpu.pipeline_mode<synchronous>, transform_indices = @transform_2, window_bounds = array<i64: 128, 128>}, {pipeline_mode = #tpu.pipeline_mode<synchronous>, transform_indices = @transform_3, window_bounds = array<i64: 1, 128>}, {transform_indices = @transform_4, window_bounds = array<i64: 16, 128>}]} {
    %c0_i32 = arith.constant 0 : i32
    %0 = arith.cmpi eq, %arg1, %c0_i32 : i32
    %1 = arith.extui %0 : i1 to i32
    %c0_i32_0 = arith.constant 0 : i32
    %2 = arith.cmpi ne, %1, %c0_i32_0 : i32
    scf.if %2 {
      %cst_10 = arith.constant 0.000000e+00 : f32
      %12 = vector.broadcast %cst_10 : f32 to vector<16x128xf32>
      %c0_11 = arith.constant 0 : index
      %c0_12 = arith.constant 0 : index
      %13 = vector.load %arg7[%c0_11, %c0_12] : memref<16x128xf32, #tpu.memory_space<vmem>>, vector<16x128xf32>
      tpu.vector_store %arg7[%c0_11, %c0_12], %12 {strides = array<i32>} : memref<16x128xf32, #tpu.memory_space<vmem>>, vector<16x128xf32>,
    } else {
    }
    %c0 = arith.constant 0 : index
    %c0_1 = arith.constant 0 : index
    %3 = vector.load %arg2[%c0, %c0_1] : memref<16x128xbf16, #tpu.memory_space<vmem>>, vector<16x128xbf16>
    %c0_2 = arith.constant 0 : index
    %c0_3 = arith.constant 0 : index
    %4 = vector.load %arg7[%c0_2, %c0_3] : memref<16x128xf32, #tpu.memory_space<vmem>>, vector<16x128xf32>
    %c0_4 = arith.constant 0 : index
    %c0_5 = arith.constant 0 : index
    %5 = vector.load %arg3[%c0_4, %c0_5] : memref<128x128xbf16, #tpu.memory_space<vmem>>, vector<128x128xbf16>
    %cst = arith.constant dense<0.000000e+00> : vector<16x128xf32>
    %6 = tpu.matmul %3, %5, %cst {dimension_numbers = #tpu.dot_dimension_numbers<[1], [0], [0], [1], [0, 0, 1, 1], [], []>} : vector<16x128xbf16>, vector<128x128xbf16>, vector<16x128xf32> -> vector<16x128xf32>
    %7 = arith.addf %4, %6 : vector<16x128xf32>
    %c0_6 = arith.constant 0 : index
    %c0_7 = arith.constant 0 : index
    %8 = vector.load %arg7[%c0_6, %c0_7] : memref<16x128xf32, #tpu.memory_space<vmem>>, vector<16x128xf32>
    tpu.vector_store %arg7[%c0_6, %c0_7], %7 {strides = array<i32>} : memref<16x128xf32, #tpu.memory_space<vmem>>, vector<16x128xf32>,
    %c0_i32_8 = arith.constant 0 : i32
    %9 = arith.cmpi eq, %arg1, %c0_i32_8 : i32
    %10 = arith.extui %9 : i1 to i32
    %c0_i32_9 = arith.constant 0 : i32
    %11 = arith.cmpi ne, %10, %c0_i32_9 : i32
    scf.if %11 {
      %c0_10 = arith.constant 0 : index
      %c0_11 = arith.constant 0 : index
      %12 = vector.load %arg7[%c0_10, %c0_11] : memref<16x128xf32, #tpu.memory_space<vmem>>, vector<16x128xf32>
      %13 = vector.extract_strided_slice %12 {offsets = [0, 16], sizes = [16, 1], strides = [1, 1]} : vector<16x128xf32> to vector<16x1xf32>
      %cst_12 = arith.constant 0.000000e+00 : f32
      %14 = vector.broadcast %cst_12 : f32 to vector<16x1xf32>
      %15 = arith.cmpf ogt, %13, %14 : vector<16x1xf32>
      %cst_13 = arith.constant 1.000000e+00 : f32
      %16 = vector.broadcast %cst_13 : f32 to vector<16x1xf32>
      %17 = arith.maximumf %13, %16 : vector<16x1xf32>
      %18 = tpu.reciprocal %17 {approx = true} : vector<16x1xf32> -> vector<16x1xf32>
      %cst_14 = arith.constant 0.000000e+00 : f32
      %19 = vector.broadcast %cst_14 : f32 to vector<16x1xf32>
      %20 = arith.select %15, %18, %19 : vector<16x1xi1>, vector<16x1xf32>
      %21 = vector.broadcast %20 : vector<16x1xf32> to vector<16x128xf32>
      %22 = arith.mulf %12, %21 : vector<16x128xf32>
      %c0_15 = arith.constant 0 : index
      %c0_16 = arith.constant 0 : index
      %23 = vector.load %arg4[%c0_15, %c0_16] : memref<128x128xf32, #tpu.memory_space<vmem>>, vector<128x128xf32>
      %cst_17 = arith.constant dense<0.000000e+00> : vector<16x128xf32>
      %24 = tpu.matmul %22, %23, %cst_17 {dimension_numbers = #tpu.dot_dimension_numbers<[1], [0], [0], [1], [0, 0, 1, 1], [], []>} : vector<16x128xf32>, vector<128x128xf32>, vector<16x128xf32> -> vector<16x128xf32>
      %c0_18 = arith.constant 0 : index
      %c0_19 = arith.constant 0 : index
      %25 = vector.load %arg5[%c0_18, %c0_19] : memref<1x128xf32, #tpu.memory_space<vmem>>, vector<1x128xf32>
      %26 = vector.broadcast %25 : vector<1x128xf32> to vector<16x128xf32>
      %27 = arith.addf %24, %26 : vector<16x128xf32>
      %cst_20 = arith.constant 0.000000e+00 : f32
      %28 = vector.broadcast %cst_20 : f32 to vector<16x128xf32>
      %29 = arith.maximumf %27, %28 : vector<16x128xf32>
      %c0_21 = arith.constant 0 : index
      %c0_22 = arith.constant 0 : index
      %30 = vector.load %arg6[%c0_21, %c0_22] : memref<16x128xf32, #tpu.memory_space<vmem>>, vector<16x128xf32>
      tpu.vector_store %arg6[%c0_21, %c0_22], %29 {strides = array<i32>} : memref<16x128xf32, #tpu.memory_space<vmem>>, vector<16x128xf32>,
    } else {
    }
    return
  }
  func.func @transform_0(%arg0: i32, %arg1: i32) -> (i32, i32) {
    %c0_i32 = arith.constant 0 : i32
    return %arg0, %arg1 : i32, i32
  }
  func.func @transform_1(%arg0: i32, %arg1: i32) -> (i32, i32) {
    %c0_i32 = arith.constant 0 : i32
    %c0_i32_0 = arith.constant 0 : i32
    return %arg1, %c0_i32 : i32, i32
  }
  func.func @transform_2(%arg0: i32, %arg1: i32) -> (i32, i32) {
    %c0_i32 = arith.constant 0 : i32
    %c0_i32_0 = arith.constant 0 : i32
    %c0_i32_1 = arith.constant 0 : i32
    return %c0_i32, %c0_i32_0 : i32, i32
  }
  func.func @transform_3(%arg0: i32, %arg1: i32) -> (i32, i32) {
    %c0_i32 = arith.constant 0 : i32
    %c0_i32_0 = arith.constant 0 : i32
    %c0_i32_1 = arith.constant 0 : i32
    return %c0_i32, %c0_i32_0 : i32, i32
  }
  func.func @transform_4(%arg0: i32, %arg1: i32) -> (i32, i32) {
    %c0_i32 = arith.constant 0 : i32
    %c0_i32_0 = arith.constant 0 : i32
    return %arg0, %c0_i32 : i32, i32
  }
}

</mosaic_0001>

<bundles_post_ra>
// kernel: tpu_custom_call.1
= control target key start
LH: loop header
LB: loop body
LE: loop exit
PB: predicated region body
PF: predicated region fallthrough
CT: control target
= control target key end

     0   :  { %9 = vsyncpa [#allocation5], 0  ;;  %s472_s0 = inlined_call_operand.hbm [shape: bf16[16,128], index: 0, kind: input, shape index: {}]   ;;  %s473_s1 = inlined_call_operand.hbm [shape: bf16[128,128], index: 1, kind: input, shape index: {}]   ;;  %s474_s2 = inlined_call_operand.hbm [shape: f32[128,128], index: 2, kind: input, shape index: {}]   ;;  %s475_s3 = inlined_call_operand.vmem [shape: f32[1,128], index: 3, kind: input, shape index: {}]   ;;  %s476_s4 = inlined_call_operand.hbm [shape: f32[16,128], index: 4, kind: output, shape index: {}]  }
   0x1   :  { %10 = vsyncpa [#allocation8], 0 }
   0x2   :  { %11 = vsyncpa [#allocation6], 0  ;;  %s29_s17 = sshll.u32 %s473_s1, 4  ;;  %s417_s18 = smov [#allocation7]   ;;  %s30_s17 = int_to_ptr.hbm [resolvable:$true] %s29_s17 }
   0x3   :  { %s31_s19 = sshll.u32 %s417_s18, 4  ;;  %s16_s22 = sshll.u32 %s472_s0, 4  ;;  %s32_s19 = int_to_ptr.vmem [resolvable:$true] %s31_s19  ;;  %s17_s22 = int_to_ptr.hbm [resolvable:$true] %s16_s22 }
   0x4   :  { %s418_s23 = smov 64   ;;  %s419_s24 = smov 4  }
   0x5   :  { %37 = dma.hbm_to_vmem [thread:$0]  %s30_s17, 1024, %s32_s19, [#allocation8], %s418_s23, %s418_s23, %s419_s24  }
   0x6   :  { %s420_s25 = smov [#allocation4]   ;;  %s42_s29 = sshll.u32 %s474_s2, 4  ;;  %s43_s29 = int_to_ptr.hbm [resolvable:$true] %s42_s29 }
   0x7   :  { %s18_s26 = sshll.u32 %s420_s25, 4  ;;  %s421_s1 = smov [#allocation9]   ;;  %s19_s26 = int_to_ptr.vmem [resolvable:$true] %s18_s26 }
   0x8   :  { %24 = dma.hbm_to_vmem [thread:$0]  %s17_s22, 128, %s19_s26, [#allocation5], %s418_s23, %s418_s23, %s419_s24  }
   0x9   :  { %s44_s30 = sshll.u32 %s421_s1, 4  ;;  %s422_s5 = smov 128   ;;  %s45_s30 = int_to_ptr.vmem [resolvable:$true] %s44_s30 }
   0xa   :  { %s423_s6 = smov 8  }
   0xb   :  { %50 = dma.hbm_to_vmem [thread:$0]  %s43_s29, 2048, %s45_s30, [#allocation8], %s422_s5, %s422_s5, %s423_s6  }
   0xc   :  { %411 = dma.done.wait [#allocation5], 128  }
   0xd   :  { %412 = vsyncadd [#allocation5], 4294967168 }
   0xe   :  { %413 = dma.done.wait [#allocation8], 3072  }
   0xf   :  { %414 = vsyncadd [#allocation8], 4294964224  ;;  %v299_v0 = vld [vmem:[#allocation7 + $0x38] sm:$0xff]  ;;  %v298_v1 = vld [vmem:[#allocation7 + $0x30] sm:$0xff]  ;;  %v424_v9 = vmov 16   ;;  %s425_s7 = smov [#allocation10]  }
  0x10   :  { %145 = vmatpush.bf16.msra.mxu0 %v299_v0  ;;  %v297_v2 = vld [vmem:[#allocation7 + $0x28] sm:$0xff]  ;;  %v296_v3 = vld [vmem:[#allocation7 + $0x20] sm:$0xff]  ;;  %v295_v4 = vld [vmem:[#allocation7 + $0x18] sm:$0xff]  ;;  %309 = vset.pattern.permute.xlu0 %v424_v9  ;;  %s239_s8 = sshll.u32 %s425_s7, 4  ;;  %s241_s11 = sshll.u32 %s476_s4, 4  ;;  %s240_s8 = int_to_ptr.vmem [resolvable:$true] %s239_s8  ;;  %s242_s11 = int_to_ptr.hbm [resolvable:$true] %s241_s11 }
  0x11   :  { %v294_v5 = vld [vmem:[#allocation7 + $0x10] sm:$0xff]  ;;  %v293_v6 = vld [vmem:[#allocation7 + $0x8] sm:$0xff]  ;;  %v292_v7 = vld [vmem:[#allocation7] sm:$0xff] }
  0x12   :  { %v291_v8 = vld [vmem:[#allocation4] sm:$0xff]  ;;  %v202_v11 = vld [vmem:[#allocation9 + $0x70] sm:$0xff]  ;;  %v201_v12 = vld [vmem:[#allocation9 + $0x68] sm:$0xff] }
  0x13   :  { %v203_v10 = vld [vmem:[#allocation9 + $0x78] sm:$0xff]  ;;  %v200_v13 = vld [vmem:[#allocation9 + $0x60] sm:$0xff]  ;;  %v198_v15 = vld [vmem:[#allocation9 + $0x50] sm:$0xff] }
  0x14   :  { %146 = vmatpush.bf16.msra.mxu0 %v298_v1  ;;  %208 = vmatpush.msra.mxu1 %v203_v10  ;;  %v199_v14 = vld [vmem:[#allocation9 + $0x58] sm:$0xff]  ;;  %v197_v16 = vld [vmem:[#allocation9 + $0x48] sm:$0xff]  ;;  %v196_v17 = vld [vmem:[#allocation9 + $0x40] sm:$0xff] }
  0x15   :  { %v195_v20 = vld [vmem:[#allocation9 + $0x38] sm:$0xff]  ;;  %v194_v21 = vld [vmem:[#allocation9 + $0x30] sm:$0xff]  ;;  %v193_v22 = vld [vmem:[#allocation9 + $0x28] sm:$0xff] }
  0x16   :  { %209 = vmatpush.msra.mxu1 %v202_v11  ;;  %v192_v23 = vld [vmem:[#allocation9 + $0x20] sm:$0xff]  ;;  %v191_v27 = vld [vmem:[#allocation9 + $0x18] sm:$0xff]  ;;  %v190_v29 = vld [vmem:[#allocation9 + $0x10] sm:$0xff] }
  0x17   :  { %v189_v30 = vld [vmem:[#allocation9 + $0x8] sm:$0xff]  ;;  %v188_v33 = vld [vmem:[#allocation9] sm:$0xff]  ;;  %v310_v38 = vld [vmem:[%s475_s3] ss:$0 sm:$0xff] }
  0x18   :  { %147 = vmatpush.bf16.msra.mxu0 %v297_v2  ;;  %210 = vmatpush.msra.mxu1 %v201_v12 }
  0x1a   :  { %211 = vmatpush.msra.mxu1 %v200_v13 }
  0x1c   :  { %148 = vmatpush.bf16.msra.mxu0 %v296_v3  ;;  %212 = vmatpush.msra.mxu1 %v199_v14 }
  0x1e   :  { %213 = vmatpush.msra.mxu1 %v198_v15 }
  0x20   :  { %149 = vmatpush.bf16.msra.mxu0 %v295_v4  ;;  %214 = vmatpush.msra.mxu1 %v197_v16 }
  0x22   :  { %215 = vmatpush.msra.mxu1 %v196_v17 }
  0x24   :  { %150 = vmatpush.bf16.msra.mxu0 %v294_v5  ;;  %216 = vmatpush.msra.mxu1 %v195_v20 }
  0x26   :  { %217 = vmatpush.msra.mxu1 %v194_v21 }
  0x28   :  { %151 = vmatpush.bf16.msra.mxu0 %v293_v6  ;;  %218 = vmatpush.msra.mxu1 %v193_v22 }
  0x2a   :  { %219 = vmatpush.msra.mxu1 %v192_v23 }
  0x2c   :  { %152 = vmatpush.bf16.msra.mxu0 %v292_v7  ;;  %220 = vmatpush.msra.mxu1 %v191_v27 }
  0x2e   :  { %221 = vmatpush.msra.mxu1 %v190_v29 }
  0x2f   :  { %153 = vmatmul.bf16.vlgmr.msra.gmra.mxu0 %v291_v8 }
  0x30   :  { %222 = vmatpush.msra.mxu1 %v189_v30 }
  0x32   :  { %223 = vmatpush.msra.mxu1 %v188_v33 }
  0xac   :  { %v154_v18 = vpop.f32.mrf.mxu0 }
  0xad   :  { %v170_v19 = vmax.f32 %v154_v18, 1.0  ;;  %vm168_vm0 = vcmp.gt.f32.partialorder %v154_v18, 0.0 }
  0xaf   :  { %311 = vrcp.f32 %v170_v19 }
  0xb4   :  { %v156_v24 = vpop.f32.mrf.mxu0 }
  0xb5   :  { %v312_v25 = vpop.eup %311  ;;  %v171_v26 = vmax.f32 %v156_v24, 1.0  ;;  %vm169_vm1 = vcmp.gt.f32.partialorder %v156_v24, 0.0 }
  0xb6   :  { %v174_v28 = vsel %vm168_vm0, %v312_v25, 0.0 }
  0xb7   :  { %313 = vrcp.f32 %v171_v26  ;;  %178 = vperm.xlu0 %309, %v174_v28  }
  0xbd   :  { %v314_v31 = vpop.eup %313 }
  0xbe   :  { %v175_v32 = vsel %vm169_vm1, %v314_v31, 0.0 }
  0xbf   :  { %183 = vperm.xlu0 %309, %v175_v32  }
 0x129   :  { %v179_v34 = vpop.permute.xlu0 %178 }
 0x12a   :  { %v186_v35 = vmul.f32 %v179_v34, %v154_v18 }
 0x12c   :  { %224 = vmatmul.f32.vlgmr.msra.gmra.mxu1 %v186_v35 }
 0x131   :  { %v184_v36 = vpop.permute.xlu0 %183 }
 0x132   :  { %v187_v37 = vmul.f32 %v184_v36, %v156_v24 }
 0x134   :  { %227 = vmatmul.f32.gmra.mxu1 %v187_v37 }
 0x1a9   :  { %v225_v39 = vpop.f32.mrf.mxu1 }
 0x1aa   :  { %v226_v40 = vadd.f32 %v310_v38, %v225_v39 }
 0x1ac   :  { %v231_v41 = vmax.f32 %v226_v40, 0.0 }
 0x1ae   :  { %233 = vst [vmem:[#allocation10] sm:$0xff] %v231_v41 }
 0x1b1   :  { %v228_v42 = vpop.f32.mrf.mxu1 }
 0x1b2   :  { %v229_v43 = vadd.f32 %v310_v38, %v228_v42 }
 0x1b4   :  { %v232_v44 = vmax.f32 %v229_v43, 0.0 }
 0x1b6   :  { %234 = vst [vmem:[#allocation10 + $0x8] sm:$0xff] %v232_v44 }
 0x1b7   :  { %247 = dma.vmem_to_hbm [thread:$0]  %s240_s8, 256, %s242_s11, [#allocation6], %s422_s5, %s422_s5, %s423_s6  }
 0x1b8   :  { %415 = dma.done.wait [#allocation6], 256  }
 0x1b9   :  { %416 = vsyncadd [#allocation6], 4294967040 }
 0x1ba   :  { %252 = vsyncpa [#allocation5], 1 }
 0x1bb   :  { %253 = vsyncpa [#allocation8], 1 }
 0x1bc   :  { %254 = vsyncpa [#allocation6], 1 }

</bundles_post_ra>
